<compile_context>
chip_gen: v5e
topology: v5e:2x2
jax: 0.10.0
libtpu: 0.0.40
codegen_flags: <defaults>
</compile_context>

<pallas_src>
import functools
import math

import jax
import jax.numpy as jnp
from jax.experimental import pallas as pl
from jax.experimental.pallas import tpu as pltpu


def _round_up(x, m):
    return ((x + m - 1) // m) * m


# -----------------------------------------------------------------------------
# Kernels
# -----------------------------------------------------------------------------

def _conv_tiled_kernel(x_ref, xh_ref, w_ref, o_ref, x1_ref, *,
                       dilation, l_tile, compute_dtype):
    # x_ref : (1, Cin, TL)   current L tile of x (tap-0 source); ragged last tile is
    #                        a partial HBM read, stale tail columns only feed output
    #                        columns that Pallas masks on the store.
    # xh_ref: (1, Cin, H)    halo = first H columns of the next tile (index clamped
    #                        in-bounds by the wrapper's index_map).
    # w_ref : (2, Cout, Cin) both taps; constant block -> stays resident in VMEM.
    # o_ref : (1, Cout, TL)  output tile (last tile partially written by Pallas).
    # x1_ref: (Cin, TL)      scratch holding the tap-1 operand x[:, d : d+TL].
    d = dilation
    x = x_ref[0]
    if x.dtype != compute_dtype:
        x = x.astype(compute_dtype)           # in-kernel cast (no wrapper HBM pass)

    # Assemble the tap-1 operand with two direct region copies into scratch
    # (cheaper than concat+slice: ~TL columns copied instead of ~2*(TL+H)).
    if d < l_tile:
        x1_ref[:, :l_tile - d] = x[:, d:]
    x1_ref[:, l_tile - d:] = xh_ref[0, :, :d].astype(compute_dtype)

    w0 = w_ref[0]                             # tap at t
    w1 = w_ref[1]                             # tap at t + dilation
    acc = jnp.dot(w0, x, preferred_element_type=jnp.float32)
    acc = acc + jnp.dot(w1, x1_ref[...], preferred_element_type=jnp.float32)
    o_ref[0] = acc.astype(o_ref.dtype)


def _conv_row_kernel(x_ref, w_ref, o_ref, *, dilation, l_out, compute_dtype):
    # Whole-(Cin, L)-row fallback for sequences too short to tile
    # (l_out < round_up(dilation, 128)).  All blocks equal the full array dims,
    # so no padding is required anywhere.
    x = x_ref[0]
    if x.dtype != compute_dtype:
        x = x.astype(compute_dtype)
    acc = jnp.dot(w_ref[0], x[:, :l_out], preferred_element_type=jnp.float32)
    acc = acc + jnp.dot(w_ref[1], x[:, dilation:dilation + l_out],
                        preferred_element_type=jnp.float32)
    o_ref[0] = acc.astype(o_ref.dtype)


# -----------------------------------------------------------------------------
# VMEM sizing
# -----------------------------------------------------------------------------

def _vmem_limit_bytes():
    """Generation-aware scoped-VMEM limit: ~3/4 of physical VMEM (48 MiB on v7x's
    64 MiB, 96 MiB on v5e/v6e's 128 MiB).  Conservative fallback if the hardware
    query is unavailable."""
    try:
        cap = int(pltpu.get_tpu_info().vmem_capacity_bytes)
    except Exception:                # off-TPU / older runtime: assume the smallest
        cap = 64 * 1024 * 1024       # (v7x) physical VMEM
    return max(32 * 1024 * 1024, min(cap * 3 // 4, 112 * 1024 * 1024))


def _choose_l_tile(l_out, halo, cin, cout, in_isz, cp_isz, out_isz, budget_bytes):
    """Largest L tile (multiple of `halo`, itself a multiple of 128) whose full
    working set fits `budget_bytes`.  Counts the double-buffered x / halo / output
    streams, the (double-buffered) resident weight block, the tap-1 scratch and the
    in-kernel f32 matmul temporaries.  Capped at 32K columns and at the halo-floored
    problem size (the last tile is ragged, never padded)."""
    unit = halo
    per_col = (2 * cin * in_isz           # x tile, double-buffered
               + 2 * cout * out_isz       # output tile, double-buffered
               + cin * cp_isz             # tap-1 scratch
               + 2 * cout * 4)            # f32 accumulator + tap-1 dot result
    fixed = 2 * cin * halo * in_isz + 2 * 2 * cout * cin * cp_isz
    t_budget = max(unit, (budget_bytes - fixed) // per_col)
    t = min(t_budget, 32 * 1024, (l_out // unit) * unit)
    return max(unit, (t // unit) * unit)


# -----------------------------------------------------------------------------
# Wrapper
# -----------------------------------------------------------------------------

def causal_conv1d(x, weight, dilation=1, *, compute_dtype=None, out_dtype=None,
                  l_tile=None):
    """Valid dilated K=2 Conv1d (no bias), PyTorch NCL layout.

    x:             (N, Cin, L)
    weight:        (Cout, Cin, 2)    (PyTorch Conv1d weight layout)
    returns:       (N, Cout, L - dilation)

    compute_dtype: MXU input dtype (defaults to x.dtype, so a bf16 x runs a bf16
                   kernel).  If it differs from x.dtype the cast happens inside the
                   kernel, never as an extra HBM pass in the wrapper.
    out_dtype:     dtype of the result (defaults to x.dtype).
    l_tile:        optional L-tile override (multiple of round_up(dilation, 128) and
                   <= L - dilation); mainly for testing the tiled path.
    """
    N, Cin, L = x.shape
    Cout, Cin_w, K = weight.shape
    assert Cin_w == Cin and K == 2, "expected PyTorch Conv1d weight (Cout, Cin, 2)"
    assert dilation >= 1
    l_out = L - dilation
    assert l_out > 0, "sequence too short for this dilation"

    compute_dtype = jnp.dtype(x.dtype if compute_dtype is None else compute_dtype)
    out_dtype = jnp.dtype(x.dtype if out_dtype is None else out_dtype)
    in_isz = jnp.dtype(x.dtype).itemsize
    cp_isz = compute_dtype.itemsize
    out_isz = out_dtype.itemsize

    # Weight: (Cout, Cin, 2) -> (2, Cout, Cin).  Tiny array -> negligible traffic.
    # x itself is handed to the kernel unpadded and unsliced.
    w_p = jnp.transpose(weight, (2, 0, 1)).astype(compute_dtype)

    vmem_limit = _vmem_limit_bytes()
    halo = _round_up(dilation, 128)          # lane-aligned halo covering the shift

    compiler_params = pltpu.CompilerParams(
        dimension_semantics=("parallel",),
        vmem_limit_bytes=vmem_limit,
    )

    # ---- short-sequence path: whole (Cin, L) row per grid step -----------------
    if l_out < halo:
        kernel = functools.partial(_conv_row_kernel, dilation=dilation,
                                   l_out=l_out, compute_dtype=compute_dtype)
        cost = pl.CostEstimate(
            flops=4 * N * Cout * Cin * l_out,        # 2 taps * 2 flops per MAC
            transcendentals=0,
            bytes_accessed=(N * Cin * L * in_isz + w_p.size * cp_isz
                            + N * Cout * l_out * out_isz))
        return pl.pallas_call(
            kernel,
            out_shape=jax.ShapeDtypeStruct((N, Cout, l_out), out_dtype),
            grid_spec=pltpu.PrefetchScalarGridSpec(
                num_scalar_prefetch=0,
                grid=(N,),
                in_specs=[pl.BlockSpec((1, Cin, L), lambda n: (n, 0, 0)),
                          pl.BlockSpec((2, Cout, Cin), lambda n: (0, 0, 0))],
                out_specs=pl.BlockSpec((1, Cout, l_out), lambda n: (n, 0, 0)),
            ),
            compiler_params=compiler_params,
            cost_estimate=cost,
        )(x, w_p)

    # ---- general path: L tiled, halo block feeds the dilated tap ---------------
    if l_tile is None:
        tl = _choose_l_tile(l_out, halo, Cin, Cout, in_isz, cp_isz, out_isz,
                            budget_bytes=vmem_limit - 8 * 1024 * 1024)
    else:
        assert l_tile > 0 and l_tile % halo == 0 and l_tile <= l_out, (
            "l_tile must be a multiple of round_up(dilation, 128) and <= L - dilation")
        tl = l_tile
    num_l_tiles = pl.cdiv(l_out, tl)
    hpb = tl // halo                          # halo blocks per main tile
    max_halo_blk = (L - 1) // halo            # last halo block whose start is in bounds

    def _nj(i):
        return i // num_l_tiles, i % num_l_tiles

    def x_map(i):
        n, j = _nj(i)
        return (n, 0, j)

    def halo_map(i):
        n, j = _nj(i)
        # Clamp the halo start in-bounds.  Whenever the clamp engages, the tile's
        # valid output columns never read the halo (they would need x[t+d] with
        # t+d >= L); any stale halo columns only feed output columns that Pallas
        # masks on the ragged last store.
        return (n, 0, jnp.minimum((j + 1) * hpb, max_halo_blk))

    def o_map(i):
        n, j = _nj(i)
        return (n, 0, j)

    kernel = functools.partial(_conv_tiled_kernel, dilation=dilation, l_tile=tl,
                               compute_dtype=compute_dtype)

    cost = pl.CostEstimate(
        flops=4 * N * Cout * Cin * l_out,                       # 2 taps * 2 flops/MAC
        transcendentals=0,
        bytes_accessed=(N * Cin * L * in_isz                    # x, read once
                        + N * num_l_tiles * Cin * halo * in_isz  # halo re-reads
                        + w_p.size * cp_isz
                        + N * Cout * l_out * out_isz))

    return pl.pallas_call(
        kernel,
        out_shape=jax.ShapeDtypeStruct((N, Cout, l_out), out_dtype),
        grid_spec=pltpu.PrefetchScalarGridSpec(
            num_scalar_prefetch=0,
            # Flattened (batch x L-tile) grid: a single parallel axis keeps both
            # v7x TensorCores busy even when N == 1; harmless on v5e/v6e.
            grid=(N * num_l_tiles,),
            in_specs=[
                pl.BlockSpec((1, Cin, tl), x_map),        # main L tile (tap-0 source)
                pl.BlockSpec((1, Cin, halo), halo_map),   # head of the next tile
                # Constant-index weight block: DMA'd once and kept resident.
                pl.BlockSpec((2, Cout, Cin), lambda i: (0, 0, 0)),
            ],
            out_specs=pl.BlockSpec((1, Cout, tl), o_map),
            scratch_shapes=[pltpu.VMEM((Cin, tl), compute_dtype)],   # tap-1 operand
        ),
        compiler_params=compiler_params,
        cost_estimate=cost,
    )(x, x, w_p)


# -----------------------------------------------------------------------------
# Reference + demo
# -----------------------------------------------------------------------------

def kaiming_normal_weight(key, out_chan, in_chan, k=2, nonlinearity="linear"):
    # PyTorch kaiming_normal_, mode='fan_in', nonlinearity='linear' -> gain = 1.
    fan_in = in_chan * k
    std = 1.0 / math.sqrt(fan_in)
    return std * jax.random.normal(key, (out_chan, in_chan, k), dtype=jnp.float32)


def _reference_conv1d(x, weight, dilation):
    # Pure-JAX reference (lax conv), for sanity checking the kernel.
    return jax.lax.conv_general_dilated(
        x, weight,
        window_strides=(1,),
        padding="VALID",
        rhs_dilation=(dilation,),
        dimension_numbers=("NCH", "OIH", "NCH"),
    )


if __name__ == "__main__":
    key = jax.random.PRNGKey(0)

    def run_case(k, N, Cin, Cout, L, dilation, compute_dtype=None, l_tile=None,
                 atol=1e-4, rtol=1e-4):
        kx, kw = jax.random.split(k)
        x = jax.random.normal(kx, (N, Cin, L), dtype=jnp.float32)
        w = kaiming_normal_weight(kw, Cout, Cin, k=2)
        out = causal_conv1d(x, w, dilation=dilation, compute_dtype=compute_dtype,
                            l_tile=l_tile)
        out = jax.block_until_ready(out)
        ref = _reference_conv1d(x, w, dilation)
        assert out.shape == (N, Cout, L - dilation), out.shape
        err = float(jnp.max(jnp.abs(out.astype(jnp.float32) - ref)))
        assert jnp.allclose(out.astype(jnp.float32), ref, atol=atol, rtol=rtol), (
            f"mismatch N={N} Cin={Cin} Cout={Cout} L={L} d={dilation} max_err={err}")

    k0, k1, k2, k3 = jax.random.split(key, 4)
    # Small demo shape implied by the module (short sequence -> whole-row path).
    run_case(k0, N=2, Cin=4, Cout=8, L=16, dilation=2)
    # Multi-tile L path: ragged last tile + fully-clamped (out-of-range) halo.
    run_case(k1, N=2, Cin=4, Cout=8, L=300, dilation=1, l_tile=128)
    # Dilation == halo width (tap-1 comes entirely from the halo), odd channel
    # counts, N=1 (flattened parallel grid), partially in-bounds last halo read.
    run_case(k2, N=1, Cin=6, Cout=5, L=400, dilation=128, l_tile=128)
    # bf16 compute path (in-kernel cast, f32 MXU accumulation), looser tolerance.
    run_case(k3, N=2, Cin=4, Cout=8, L=300, dilation=2,
             compute_dtype=jnp.bfloat16, atol=1e-1, rtol=1e-1)

    print("KERNEL_OK")
</pallas_src>

<mosaic_0001>
module attributes {stable_mosaic.version = 11 : i64} {
  func.func @_conv_row_kernel(%arg0: i32, %arg1: memref<1x4x16xf32, #tpu.memory_space<vmem>>, %arg2: memref<2x8x4xf32, #tpu.memory_space<vmem>>, %arg3: memref<1x8x14xf32, #tpu.memory_space<vmem>>) attributes {dimension_semantics = [#tpu.dimension_semantics<parallel>], iteration_bounds = array<i64: 2>, scalar_prefetch = 0 : i64, scratch_operands = 0 : i64, tpu.core_type = #tpu.core_type<tc>, window_params = [{transform_indices = @transform_0, window_bounds = array<i64: 1, 4, 16>}, {pipeline_mode = #tpu.pipeline_mode<synchronous>, transform_indices = @transform_1, window_bounds = array<i64: 2, 8, 4>}, {transform_indices = @transform_2, window_bounds = array<i64: 1, 8, 14>}]} {
    %c0 = arith.constant 0 : index
    %c0_0 = arith.constant 0 : index
    %c0_1 = arith.constant 0 : index
    %0 = vector.load %arg1[%c0, %c0_0, %c0_1] : memref<1x4x16xf32, #tpu.memory_space<vmem>>, vector<1x4x16xf32>
    %1 = vector.shape_cast %0 : vector<1x4x16xf32> to vector<4x16xf32>
    %c0_2 = arith.constant 0 : index
    %c0_3 = arith.constant 0 : index
    %c0_4 = arith.constant 0 : index
    %2 = vector.load %arg2[%c0_2, %c0_3, %c0_4] : memref<2x8x4xf32, #tpu.memory_space<vmem>>, vector<1x8x4xf32>
    %3 = vector.shape_cast %2 : vector<1x8x4xf32> to vector<8x4xf32>
    %4 = vector.extract_strided_slice %1 {offsets = [0, 0], sizes = [4, 14], strides = [1, 1]} : vector<4x16xf32> to vector<4x14xf32>
    %cst = arith.constant dense<0.000000e+00> : vector<8x14xf32>
    %5 = tpu.matmul %3, %4, %cst {dimension_numbers = #tpu.dot_dimension_numbers<[1], [0], [0], [1], [0, 0, 1, 1], [], []>} : vector<8x4xf32>, vector<4x14xf32>, vector<8x14xf32> -> vector<8x14xf32>
    %c1 = arith.constant 1 : index
    %c0_5 = arith.constant 0 : index
    %c0_6 = arith.constant 0 : index
    %6 = vector.load %arg2[%c1, %c0_5, %c0_6] : memref<2x8x4xf32, #tpu.memory_space<vmem>>, vector<1x8x4xf32>
    %7 = vector.shape_cast %6 : vector<1x8x4xf32> to vector<8x4xf32>
    %8 = vector.extract_strided_slice %1 {offsets = [0, 2], sizes = [4, 14], strides = [1, 1]} : vector<4x16xf32> to vector<4x14xf32>
    %cst_7 = arith.constant dense<0.000000e+00> : vector<8x14xf32>
    %9 = tpu.matmul %7, %8, %cst_7 {dimension_numbers = #tpu.dot_dimension_numbers<[1], [0], [0], [1], [0, 0, 1, 1], [], []>} : vector<8x4xf32>, vector<4x14xf32>, vector<8x14xf32> -> vector<8x14xf32>
    %10 = arith.addf %5, %9 : vector<8x14xf32>
    %c0_8 = arith.constant 0 : index
    %c0_9 = arith.constant 0 : index
    %c0_10 = arith.constant 0 : index
    %11 = vector.load %arg3[%c0_8, %c0_9, %c0_10] : memref<1x8x14xf32, #tpu.memory_space<vmem>>, vector<1x8x14xf32>
    %12 = vector.shape_cast %11 : vector<1x8x14xf32> to vector<8x14xf32>
    %13 = vector.shape_cast %10 : vector<8x14xf32> to vector<1x8x14xf32>
    tpu.vector_store %arg3[%c0_8, %c0_9, %c0_10], %13 {strides = array<i32>} : memref<1x8x14xf32, #tpu.memory_space<vmem>>, vector<1x8x14xf32>,
    return
  }
  func.func @transform_0(%arg0: i32) -> (i32, i32, i32) {
    %c0_i32 = arith.constant 0 : i32
    %c0_i32_0 = arith.constant 0 : i32
    %c0_i32_1 = arith.constant 0 : i32
    return %arg0, %c0_i32, %c0_i32_0 : i32, i32, i32
  }
  func.func @transform_1(%arg0: i32) -> (i32, i32, i32) {
    %c0_i32 = arith.constant 0 : i32
    %c0_i32_0 = arith.constant 0 : i32
    %c0_i32_1 = arith.constant 0 : i32
    %c0_i32_2 = arith.constant 0 : i32
    return %c0_i32, %c0_i32_0, %c0_i32_1 : i32, i32, i32
  }
  func.func @transform_2(%arg0: i32) -> (i32, i32, i32) {
    %c0_i32 = arith.constant 0 : i32
    %c0_i32_0 = arith.constant 0 : i32
    %c0_i32_1 = arith.constant 0 : i32
    return %arg0, %c0_i32, %c0_i32_0 : i32, i32, i32
  }
}

</mosaic_0001>

<bundles_post_ra>
// kernel: tpu_custom_call.1
= control target key start
LH: loop header
LB: loop body
LE: loop exit
PB: predicated region body
PF: predicated region fallthrough
CT: control target
= control target key end

     0   :  { %7 = vsyncpa [#allocation3], 0  ;;  %s501_s0 = inlined_call_operand.vmem [shape: f32[2,4,16], index: 0, kind: input, shape index: {}]   ;;  %s502_s1 = inlined_call_operand.vmem [shape: f32[2,8,4], index: 1, kind: input, shape index: {}]   ;;  %s503_s2 = inlined_call_operand.hbm [shape: f32[2,8,14], index: 2, kind: output, shape index: {}]  }
   0x1   :  { %9 = vsyncpa [#allocation3 + $0x1], 0  ;;  %s410_s9 = smov 0   ;;  %s412_s10 = smov 0  }
   0x2   :  { %s414_s11 = smov 0   ;;  %s416_s12 = smov 0  }
   0x3 LB: > { %s431_s13 = sadd.s32 4294967295, %s392_s12   ;;  %s275_s14 = sadd.s32 4294967294, %s392_s12   ;;  %s392_s12 = sphi %s416_s12, %s509_s12   ;;  %s388_s11 = sphi %s414_s11, %s508_s11   ;;  %s384_s10 = sphi %s412_s10, %s507_s10   ;;  %s380_s9 = sphi %s410_s9, %s506_s9  }
   0x4   : > { %s435_s15 = sadd.s32 1, %s392_s12   ;;  %s69_s16 = sadd.s32 1, %s388_s11 }
   0x5   : > { %s66_s17 = ssub.s32 %s392_s12, %s435_s15  ;;  %p79_p0 = scmp.ne.s32.totalorder %s388_s11, %s384_s10 }
   0x6   : > { %p67_p1 = scmp.eq.s32.totalorder %s66_s17, 0  ;;  %p80_p2 = scmp.eq.s32.totalorder %s431_s13, 1 }
   0x7   : > { %p85_p3 = scmp.ne.s32.totalorder %s384_s10, %s380_s9  ;;  %p86_p4 = scmp.eq.s32.totalorder %s275_s14, 1 }
   0x8   : > { %s446_s18 = scalar_select %p67_p1, %s388_s11, %s69_s16  }
   0x9   : > { %p448_p5 = por %p80_p2, %p79_p0  ;;  %p452_p6 = por %p86_p4, %p85_p3 }
   0xa   : > { %p278_p7 = scmp.ge.s32.totalorder %s392_s12, 1  ;;  %p114_p8 = scmp.lt.s32.totalorder %s392_s12, 3 }
   0xc   : > { %p115_p9 = pnand %p278_p7, %p114_p8 }
   0xd   : > { %p135_p10 = scmp.lt.s32.totalorder (!%p115_p9), %s431_s13, 1  ;;  %s394_s26 = smov (!%p115_p9), 126  }
   0xe   : > { %118 = sbr.rel (%p115_p9) target bundleno = 271 (0x10f), region = 28  ;;  %s132_s3 = sand.u32 (!%p115_p9), 1, %s384_s10  }
   0xf   : > { %s279_s4 = sshll.u32 (!%p115_p9), %s132_s3, 3  ;;  %s287_s5 = sshll.u32 (!%p115_p9), %s431_s13, 3 }
  0x10   : > { %s211_s8 = scalar_lea.hbm (!%p115_p9), %s503_s2, %s287_s5  ;;  %s134_s14 = scalar_lea.vmem (!%p115_p9), [#allocation2], %s279_s4 }
  0x11   : > { %s213_s16 = sshll.u32 (!%p115_p9), %s134_s14, 4  ;;  %s215_s17 = sshll.u32 (!%p115_p9), %s211_s8, 4  ;;  %s214_s16 = int_to_ptr.vmem [resolvable:$true] %s213_s16  ;;  %s216_s17 = int_to_ptr.hbm [resolvable:$true] %s215_s17 }
  0x13   : > { %s136_s21 = scalar_select %p135_p10, %s431_s13, 1  ;;  %vm150_vm0 = vcmask 1043456   ;;  %vm146_vm1 = vcmask 31744   ;;  %v140_v1 = vld [vmem:[%s502_s1] sm:$0xff]  ;;  %v281_v2 = vld [vmem:[%s502_s1 + $0x8] sm:$0xff]  ;;  %vm198_vm2 = vcmask 113664  }
  0x15   : > { %s280_s22 = sshll.u32 %s136_s21, 2  ;;  %s201_s21 = scalar_lea.sflag [#allocation3], %s132_s3 }
  0x16   : > { %s138_s25 = scalar_lea.vmem %s501_s0, %s280_s22  ;;  %s344_s22 = sshra.s32 %s216_s17, 4  ;;  %s345_s22 = int_to_ptr.hbm [resolvable:$true] %s344_s22 }
  0x17   : > { %v139_v0 = vld [vmem:[%s138_s25] sm:$0xf]  ;;  %s346_s23 = scalar_lea.hbm %s345_s22, 8  ;;  %s350_s25 = scalar_lea.hbm %s503_s2, 16 }
  0x18   : > { %144 = vrot.lane.b32.xlu0 %v139_v0, %s394_s26  ;;  %284 = vmatpush.msk.msra.mxu1 %vm150_vm0, %v139_v0  ;;  %p347_p11 = scmp.ne.s32.totalorder %s345_s22, %s346_s23  ;;  %p351_p0 = scmp.lt.s32.totalorder %s345_s22, %s503_s2 }
  0x19   : > { %285 = vmatmul.msk.f32.vlgmr.msra.gmra.mxu1 %vm146_vm1, %v140_v1  ;;  %p352_p1 = scmp.lt.s32.totalorder %s350_s25, %s346_s23 }
  0x1a   : > { %p348_p12 = pnand %p347_p11, %p448_p5 }
  0x1b   : > { %p353_p2 = por %p352_p1, %p351_p0 }
  0x1c   : > { %p349_p13 = pneg %p348_p12 }
  0x1e   : > { %p354_p3 = pnand %p353_p2, %p349_p13 }
  0x8a   : > { %v145_v3 = vpop.permute.xlu0 %144 }
  0x8b   : > { %282 = vmatpush.msk.msra.mxu0 %vm150_vm0, %v145_v3 }
  0x8c   : > { %283 = vmatmul.msk.f32.vlgmr.msra.gmra.mxu0 %vm146_vm1, %v281_v2 }
  0x96   : > { %v195_v4 = vpop.f32.mrf.mxu1 }
 0x109   : > { %v170_v5 = vpop.f32.mrf.mxu0 }
 0x10a   : > { %v196_v6 = vadd.f32 %v195_v4, %v170_v5 }
 0x10c   : > { %199 = vst.msk [vmem:[%s134_s14] sm:$0xff] %vm198_vm2, %v196_v6 }
 0x10d   : > { %357 = shalt.err (!%p354_p3)
}
 0x10e   : > { %290 = dma.vmem_to_hbm [thread:$0]  (%p448_p5), %s214_s16, 128, %s216_s17, %s201_s21  }
 0x10f PF: > { %p296_p4 = scmp.ge.s32.totalorder %s392_s12, 2  ;;  %s227_s28 = sand.u32 1, %s380_s9  }
 0x110   : > { %s228_s29 = scalar_lea.sflag [#allocation3], %s227_s28 }
 0x111   : > { %p293_p7 = pnand %p296_p4, %p452_p6 }
 0x113   : > { %p294_p8 = pneg %p293_p7 }
 0x115   : > { %375 = dma.done.wait (%p294_p8), %s228_s29, 128  }
 0x116   : > { %377 = vsyncadd (%p294_p8), %s228_s29, 4294967168  ;;  %p12_p9 = scmp.ge.s32.totalorder %s435_s15, 4   ;;  %s506_s9 = smov %s384_s10 }
 0x117   : > { %s507_s10 = smov %s388_s11  ;;  %s508_s11 = smov %s446_s18 }
 0x118   : > { %s509_s12 = smov %s435_s15  ;;  %14 = sbr.rel (!%p12_p9) target bundleno = 3 (0x3), region = 64 }
 0x11d   :  { %234 = vsyncpa [#allocation3], 1 }
 0x11e   :  { %236 = vsyncpa [#allocation3 + $0x1], 1 }

</bundles_post_ra>
